<compile_context>
chip_gen: v6e
topology: v6e:2x2x1
jax: 0.10.0
libtpu: 0.0.40
codegen_flags: <defaults>
</compile_context>

<pallas_src>
import math

import jax
import jax.numpy as jnp
from jax.experimental import pallas as pl
from jax.experimental.pallas import tpu as pltpu


def _round_up(v, mult):
    return (v + mult - 1) // mult * mult


def _pooler_kernel(x_ref, w_ref, b_ref, o_ref):
    # MXU matmul (native-dtype operands, f32 accumulation), then a fused
    # VPU bias-add + EUP tanh epilogue; cast to the output dtype at the store.
    y = jnp.dot(x_ref[...], w_ref[...], preferred_element_type=jnp.float32)
    y = y + b_ref[...]
    o_ref[...] = jnp.tanh(y).astype(o_ref.dtype)


def pooler_forward(w, b, hidden_state, *, block_rows=None, out_dtype=None):
    """Pooler forward: tanh(hidden_state @ w + b) over the last dim.

    hidden_state: [..., in_dim]; w: [in_dim, out_dim]; b: [out_dim]
    returns       [..., out_dim]  (dtype = hidden_state.dtype by default)
    """
    in_dim, out_dim = w.shape
    lead_shape = hidden_state.shape[:-1]
    m = int(math.prod(lead_shape)) if lead_shape else 1

    # Collapsing leading dims only — a free (metadata) reshape, no HBM pass.
    x = hidden_state.reshape(m, in_dim)
    compute_dtype = x.dtype
    if out_dtype is None:
        out_dtype = compute_dtype

    # One-time weight cast to the activation dtype (weight << activations).
    w = w.astype(compute_dtype)
    # Bias stays f32: the dot output is f32, so the epilogue is all-f32.
    b2 = b.astype(jnp.float32).reshape(1, out_dim)

    # Row tiling: single block for small m; 256-row tiles for large m
    # (VMEM-safe on v7x's 64 MiB; raise to 512 on v5e/v6e if desired).
    if block_rows is None:
        block_rows = _round_up(m, 8) if m <= 512 else 256
    grid_m = pl.cdiv(m, block_rows)

    # Column (out_dim) tiling: only split when the resident weight panel would
    # blow VMEM (large poolers).  Small/typical poolers keep grid_n == 1.
    itemsize = jnp.dtype(compute_dtype).itemsize
    max_w_bytes = 16 * 1024 * 1024
    max_bn = max(128, ((max_w_bytes // (in_dim * itemsize)) // 128) * 128)
    if out_dim % 128 == 0 and out_dim > max_bn:
        block_n = max_bn
    else:
        block_n = out_dim
    grid_n = pl.cdiv(out_dim, block_n)

    # Grid-invariant operands don't need double buffers; if the weight is
    # N-tiled it re-DMAs along j, so keep 2 buffers in that case.
    wb_mode = pl.Buffered(1) if grid_n == 1 else pl.Buffered(2)
    x_kwargs = {"pipeline_mode": pl.Buffered(3)} if grid_m >= 4 else {}

    flops = 2 * m * in_dim * out_dim
    bytes_accessed = int(
        m * in_dim * itemsize                      # x
        + in_dim * out_dim * itemsize              # w
        + out_dim * 4                              # b
        + m * out_dim * jnp.dtype(out_dtype).itemsize  # out
    )
    cost = pl.CostEstimate(flops=flops,
                           transcendentals=m * out_dim,
                           bytes_accessed=bytes_accessed)

    out = pl.pallas_call(
        _pooler_kernel,
        out_shape=jax.ShapeDtypeStruct((m, out_dim), out_dtype),
        grid=(grid_m, grid_n),
        in_specs=[
            # Row tile of x (constant across the inner j axis -> no re-DMA).
            pl.BlockSpec((block_rows, in_dim), lambda i, j: (i, 0), **x_kwargs),
            # Weight column panel, VMEM-resident (single-buffered when grid_n==1).
            pl.BlockSpec((in_dim, block_n), lambda i, j: (0, j),
                         pipeline_mode=wb_mode),
            # Bias panel.
            pl.BlockSpec((1, block_n), lambda i, j: (0, j),
                         pipeline_mode=wb_mode),
        ],
        out_specs=pl.BlockSpec((block_rows, block_n), lambda i, j: (i, j)),
        compiler_params=pltpu.CompilerParams(
            dimension_semantics=("parallel", "parallel"),
            vmem_limit_bytes=64 * 1024 * 1024),
        cost_estimate=cost,
    )(x, w, b2)

    return out.reshape(*lead_shape, out_dim)


if __name__ == "__main__":
    IN_DIM, OUT_DIM = 256, 128   # lane-aligned small dims
    B, S = 2, 8                  # hidden_state = [B, S, in_dim]

    key = jax.random.PRNGKey(0)
    k_w, k_b, k_x = jax.random.split(key, 3)

    # nn.Linear default init: U(-1/sqrt(in_dim), 1/sqrt(in_dim))
    bound = 1.0 / math.sqrt(IN_DIM)
    w = jax.random.uniform(k_w, (IN_DIM, OUT_DIM), jnp.float32, -bound, bound)
    b = jax.random.uniform(k_b, (OUT_DIM,), jnp.float32, -bound, bound)
    # Activations in the model compute dtype (bf16: MXU-native, half the HBM traffic).
    hidden_state = jax.random.normal(
        k_x, (B, S, IN_DIM), dtype=jnp.float32).astype(jnp.bfloat16)

    out = jax.jit(pooler_forward)(w, b, hidden_state)
    out = jax.block_until_ready(out)

    # Reference (f32 math).  bf16 operands + bf16 output => loose tolerance.
    ref = jnp.tanh(hidden_state.astype(jnp.float32) @ w + b)
    assert out.shape == (B, S, OUT_DIM) and out.dtype == jnp.bfloat16
    err = float(jnp.max(jnp.abs(out.astype(jnp.float32) - ref)))
    assert err < 3e-2, err
    print("KERNEL_OK")
</pallas_src>

<mosaic_0001>
module attributes {stable_mosaic.version = 11 : i64} {
  func.func @_pooler_kernel(%arg0: i32, %arg1: i32, %arg2: memref<16x256xbf16, #tpu.memory_space<vmem>>, %arg3: memref<256x128xbf16, #tpu.memory_space<vmem>>, %arg4: memref<1x128xf32, #tpu.memory_space<vmem>>, %arg5: memref<16x128xbf16, #tpu.memory_space<vmem>>) attributes {dimension_semantics = [#tpu.dimension_semantics<parallel>, #tpu.dimension_semantics<parallel>], iteration_bounds = array<i64: 1, 1>, scalar_prefetch = 0 : i64, scratch_operands = 0 : i64, tpu.core_type = #tpu.core_type<tc>, window_params = [{transform_indices = @transform_0, window_bounds = array<i64: 16, 256>}, {pipeline_mode = #tpu.pipeline_mode<synchronous>, transform_indices = @transform_1, window_bounds = array<i64: 256, 128>}, {pipeline_mode = #tpu.pipeline_mode<synchronous>, transform_indices = @transform_2, window_bounds = array<i64: 1, 128>}, {transform_indices = @transform_3, window_bounds = array<i64: 16, 128>}]} {
    %c0 = arith.constant 0 : index
    %c0_0 = arith.constant 0 : index
    %0 = vector.load %arg2[%c0, %c0_0] : memref<16x256xbf16, #tpu.memory_space<vmem>>, vector<16x256xbf16>
    %c0_1 = arith.constant 0 : index
    %c0_2 = arith.constant 0 : index
    %1 = vector.load %arg3[%c0_1, %c0_2] : memref<256x128xbf16, #tpu.memory_space<vmem>>, vector<256x128xbf16>
    %cst = arith.constant dense<0.000000e+00> : vector<16x128xf32>
    %2 = tpu.matmul %0, %1, %cst {dimension_numbers = #tpu.dot_dimension_numbers<[1], [0], [0], [1], [0, 0, 1, 1], [], []>} : vector<16x256xbf16>, vector<256x128xbf16>, vector<16x128xf32> -> vector<16x128xf32>
    %c0_3 = arith.constant 0 : index
    %c0_4 = arith.constant 0 : index
    %3 = vector.load %arg4[%c0_3, %c0_4] : memref<1x128xf32, #tpu.memory_space<vmem>>, vector<1x128xf32>
    %4 = vector.broadcast %3 : vector<1x128xf32> to vector<16x128xf32>
    %5 = arith.addf %2, %4 : vector<16x128xf32>
    %6 = math.tanh %5 : vector<16x128xf32>
    %7 = arith.truncf %6 : vector<16x128xf32> to vector<16x128xbf16>
    %c0_5 = arith.constant 0 : index
    %c0_6 = arith.constant 0 : index
    %8 = vector.load %arg5[%c0_5, %c0_6] : memref<16x128xbf16, #tpu.memory_space<vmem>>, vector<16x128xbf16>
    tpu.vector_store %arg5[%c0_5, %c0_6], %7 {strides = array<i32>} : memref<16x128xbf16, #tpu.memory_space<vmem>>, vector<16x128xbf16>,
    return
  }
  func.func @transform_0(%arg0: i32, %arg1: i32) -> (i32, i32) {
    %c0_i32 = arith.constant 0 : i32
    %c0_i32_0 = arith.constant 0 : i32
    return %arg0, %c0_i32 : i32, i32
  }
  func.func @transform_1(%arg0: i32, %arg1: i32) -> (i32, i32) {
    %c0_i32 = arith.constant 0 : i32
    %c0_i32_0 = arith.constant 0 : i32
    return %c0_i32, %arg1 : i32, i32
  }
  func.func @transform_2(%arg0: i32, %arg1: i32) -> (i32, i32) {
    %c0_i32 = arith.constant 0 : i32
    %c0_i32_0 = arith.constant 0 : i32
    return %c0_i32, %arg1 : i32, i32
  }
  func.func @transform_3(%arg0: i32, %arg1: i32) -> (i32, i32) {
    %c0_i32 = arith.constant 0 : i32
    return %arg0, %arg1 : i32, i32
  }
}

</mosaic_0001>

<bundles_post_ra>
// kernel: pooler_forward.1
= control target key start
LH: loop header
LB: loop body
LE: loop exit
PB: predicated region body
PF: predicated region fallthrough
CT: control target
= control target key end

     0   :  { %s413_s0 = inlined_call_operand.vmem [shape: bf16[16,256], index: 0, kind: input, shape index: {}]   ;;  %s414_s1 = inlined_call_operand.vmem [shape: bf16[256,128], index: 1, kind: input, shape index: {}]   ;;  %s415_s2 = inlined_call_operand.vmem [shape: f32[1,128], index: 2, kind: input, shape index: {}]   ;;  %s416_s3 = inlined_call_operand.hbm [shape: bf16[16,128], index: 3, kind: output, shape index: {}]  }
   0x1   :  { %v285_v0 = vld [vmem:[%s414_s1 + $0x78] sm:$0xff]   ;;  %v287_v2 = vld [vmem:[%s414_s1 + $0x70] sm:$0xff]   ;;  %v289_v4 = vld [vmem:[%s414_s1 + $0x68] sm:$0xff]  }
   0x2   :  { %v286_v1 = vld [vmem:[%s414_s1 + $0x38] sm:$0xff]   ;;  %260 = vmatprep.subr.bf16.mxu0 %v285_v0  ;;  %v288_v3 = vld [vmem:[%s414_s1 + $0x30] sm:$0xff]   ;;  %v290_v5 = vld [vmem:[%s414_s1 + $0x28] sm:$0xff]  }
   0x3   :  { %261 = vmatpush3.bf16.msra.mxu0 %v286_v1  ;;  %v291_v6 = vld [vmem:[%s414_s1 + $0x60] sm:$0xff]   ;;  %v293_v8 = vld [vmem:[%s414_s1 + $0x58] sm:$0xff]   ;;  %v295_v10 = vld [vmem:[%s414_s1 + $0x50] sm:$0xff]  }
   0x4   :  { %262 = vmatprep.subr.bf16.mxu0 %v287_v2  ;;  %v292_v7 = vld [vmem:[%s414_s1 + $0x20] sm:$0xff]   ;;  %v294_v9 = vld [vmem:[%s414_s1 + $0x18] sm:$0xff]  }
   0x5   :  { %v303_v11 = vld [vmem:[%s413_s0 + $0x4] ss:$8 sps:$4 sm:$0xff]  }
   0x7   :  { %263 = vmatpush3.bf16.msra.mxu0 %v288_v3 }
   0x8   :  { %264 = vmatprep.subr.bf16.mxu0 %v289_v4 }
   0xb   :  { %265 = vmatpush3.bf16.msra.mxu0 %v290_v5 }
   0xc   :  { %266 = vmatprep.subr.bf16.mxu0 %v291_v6 }
   0xf   :  { %267 = vmatpush3.bf16.msra.mxu0 %v292_v7 }
  0x10   :  { %268 = vmatprep.subr.bf16.mxu0 %v293_v8 }
  0x11   :  { %8 = vsyncpa [#allocation3], 0  ;;  %v296_v12 = vld [vmem:[%s414_s1 + $0x10] sm:$0xff]   ;;  %195 = vmatprep.mubr.bf16.mxu0 %v303_v11  ;;  %v297_v13 = vld [vmem:[%s414_s1 + $0x48] sm:$0xff]  }
  0x12   :  { %v298_v14 = vld [vmem:[%s414_s1 + $0x8] sm:$0xff]   ;;  %v299_v15 = vld [vmem:[%s414_s1 + $0x40] sm:$0xff]  }
  0x13   :  { %269 = vmatpush3.bf16.msra.mxu0 %v294_v9  ;;  %v300_v16 = vld [vmem:[%s414_s1] sm:$0xff]   ;;  %s330_s1 = smov [#allocation2]  }
  0x14   :  { %270 = vmatprep.subr.bf16.mxu0 %v295_v10  ;;  %v301_v17 = vld [vmem:[%s413_s0] ss:$8 sps:$4 sm:$0xff]   ;;  %s221_s23 = sshll.u32 %s330_s1, 4  ;;  %s222_s23 = int_to_ptr.vmem [resolvable:$true] %s221_s23 }
  0x15   :  { %v232_v20 = vld [vmem:[%s415_s2] ss:$0 sm:$0xff]  ;;  %s308_s0 = scalar_lea.vmem %s222_s23, 128  ;;  %p313_p1 = scmp.lt.s32.totalorder %s222_s23, %s222_s23 }
  0x16   :  { %p309_p0 = scmp.ne.s32.totalorder %s222_s23, %s308_s0  ;;  %p314_p2 = scmp.lt.s32.totalorder %s308_s0, %s308_s0 }
  0x17   :  { %271 = vmatpush3.bf16.msra.mxu0 %v296_v12 }
  0x18   :  { %272 = vmatprep.subr.bf16.mxu0 %v297_v13  ;;  %p315_p3 = por %p314_p2, %p313_p1 }
  0x1a   :  { %p316_p4 = pnand %p315_p3, %p309_p0 }
  0x1b   :  { %273 = vmatpush3.bf16.msra.mxu0 %v298_v14 }
  0x1c   :  { %274 = vmatprep.subr.bf16.mxu0 %v299_v15 }
  0x1f   :  { %275 = vmatpush3.bf16.msra.mxu0 %v300_v16 }
  0x22   :  { %196 = vmatmul.mubr.bf16.vlgmr.msra.gmra.mxu0 %v301_v17 }
  0xe2   :  { %v276_v18 = vpop.f32.mrf.mxu0 }
  0xe4   :  { %v277_v19 = vpop.f32.mrf.mxu0 }
  0xe5   :  { %v278_v21 = vadd.f32 %v277_v19, %v276_v18 }
  0xe6   :  { %v279_v22 = vpop.f32.mrf.mxu0 }
  0xe7   :  { %v198_v23 = vadd.f32 %v278_v21, %v232_v20 }
  0xe8   :  { %v280_v24 = vpop.f32.mrf.mxu0 }
  0xe9   :  { %v281_v25 = vadd.f32 %v280_v24, %v279_v22  ;;  %304 = vtanh.f32 %v198_v23 }
  0xeb   :  { %v201_v26 = vadd.f32 %v281_v25, %v232_v20 }
  0xed   :  { %306 = vtanh.f32 %v201_v26 }
  0xf6   :  { %v305_v27 = vpop.eup %304 }
  0xfa   :  { %v307_v28 = vpop.eup %306 }
  0xfb   :  { %v258_v29 = vpack.c.bf16 %v307_v28, %v305_v27 }
  0xfd   :  { %259 = vst [vmem:[#allocation2] sm:$0xff] %v258_v29  }
  0xfe   :  { %319 = shalt.err (!%p316_p4)
}
  0xff   :  { %s331_s2 = smov 64   ;;  %s332_s24 = smov 4  }
 0x100   :  { %227 = dma.vmem_to_hbm [thread:$0]  %s222_s23, 128, %s416_s3, [#allocation3], %s331_s2, %s331_s2, %s332_s24  }
 0x101   :  { %328 = dma.done.wait [#allocation3], 128  }
 0x102   :  { %329 = vsyncadd [#allocation3], 4294967168 }
 0x103   :  { %231 = vsyncpa [#allocation3], 1 }

</bundles_post_ra>
